<compile_context>
chip_gen: v7x
topology: tpu7x:2x2x1
jax: 0.10.0
libtpu: 0.0.40
codegen_flags: <defaults>
</compile_context>

<pallas_src>
import functools

import jax
import jax.numpy as jnp
from jax import lax
from jax.experimental import pallas as pl
from jax.experimental.pallas import tpu as pltpu


def _round_up(x: int, m: int) -> int:
    return ((x + m - 1) // m) * m


# ---------------------------------------------------------------------------
# Path 1: streaming one-hot MXU matmul (vocab small relative to token block)
# ---------------------------------------------------------------------------
def _stream_kernel(pivot, n_frozen_tiles, acc_dtype,
                   ids_ref, frozen_ref, trainable_ref, o_ref, acc_ref):
    j = pl.program_id(1)  # table-tile (reduction) axis: frozen tiles, then trainable

    @pl.when(j == 0)
    def _():
        acc_ref[...] = jnp.zeros_like(acc_ref)

    ids = ids_ref[...]  # (T, 1) int32 token ids for this token block

    def accumulate(table_ref, row_start):
        rows = table_ref.shape[0]
        lane = lax.broadcasted_iota(jnp.int32, (1, rows), 1)          # (1, R)
        onehot = (ids == (row_start + lane)).astype(table_ref.dtype)  # (T, R)
        # No table mask: tables are zero-padded to whole tiles in the wrapper,
        # so padded rows contribute exactly 0 to the accumulator.
        acc_ref[...] += jnp.dot(onehot, table_ref[...],
                                preferred_element_type=acc_dtype)

    @pl.when(j < n_frozen_tiles)
    def _():
        accumulate(frozen_ref, j * frozen_ref.shape[0])

    @pl.when(j >= n_frozen_tiles)
    def _():
        accumulate(trainable_ref,
                   pivot + (j - n_frozen_tiles) * trainable_ref.shape[0])

    @pl.when(j == pl.num_programs(1) - 1)
    def _():
        o_ref[...] = acc_ref[...].astype(o_ref.dtype)


def _pf_embedding_stream(flat_ids, frozen_w, trainable_w, pivot,
                         token_block, row_block):
    D = trainable_w.shape[1]
    n_frozen, n_trainable = frozen_w.shape[0], trainable_w.shape[0]
    n = flat_ids.shape[0]
    out_dtype = trainable_w.dtype
    # Exact gather -> bf16 accumulation loses nothing when the output is bf16.
    acc_dtype = jnp.bfloat16 if out_dtype == jnp.bfloat16 else jnp.float32

    # Token block: multiple of 8 sublanes; pad ids with a valid id (0).
    T = min(token_block, _round_up(n, 8))
    n_pad = _round_up(n, T)
    ids = jnp.pad(flat_ids, (0, n_pad - n)).reshape(n_pad, 1)

    # Zero-pad each table to whole row tiles (in a real module this would be
    # done once at init, not per forward); removes the in-kernel mask.
    def pad_table(w, rows):
        r_blk = row_block if rows > row_block else _round_up(rows, 8)
        rows_pad = _round_up(rows, r_blk)
        if rows_pad != rows:
            w = jnp.pad(w, ((0, rows_pad - rows), (0, 0)))
        return w, r_blk, rows_pad // r_blk

    frozen_p, R_f, n_frozen_tiles = pad_table(frozen_w, n_frozen)
    trainable_p, R_t, n_trainable_tiles = pad_table(trainable_w, n_trainable)
    n_tiles = n_frozen_tiles + n_trainable_tiles

    kernel = functools.partial(_stream_kernel, pivot, n_frozen_tiles, acc_dtype)

    # VMEM budget: double-buffered table tiles + resident out block + acc.
    out_item = trainable_w.dtype.itemsize
    acc_item = 2 if acc_dtype == jnp.bfloat16 else 4
    est = (2 * R_f * D * frozen_p.dtype.itemsize
           + 2 * R_t * D * trainable_p.dtype.itemsize
           + 2 * T * D * out_item
           + T * D * acc_item
           + 4 * T * 4)
    vmem_limit = int(min(max(est * 5 // 4 + (2 << 20), 32 << 20), 56 << 20))

    out = pl.pallas_call(
        kernel,
        out_shape=jax.ShapeDtypeStruct((n_pad, D), out_dtype),
        grid_spec=pltpu.PrefetchScalarGridSpec(
            num_scalar_prefetch=0,
            grid=(n_pad // T, n_tiles),
            in_specs=[
                # token ids for this block (resident across the tile axis)
                pl.BlockSpec((T, 1), lambda i, j: (i, 0)),
                # frozen tiles advance while j < n_frozen_tiles, then stay
                # clamped (no re-DMA: block index unchanged)
                pl.BlockSpec((R_f, D),
                             lambda i, j: (jnp.minimum(j, n_frozen_tiles - 1), 0)),
                # trainable tiles stay at 0 during the frozen phase, then advance
                pl.BlockSpec((R_t, D),
                             lambda i, j: (jnp.maximum(j - n_frozen_tiles, 0), 0)),
            ],
            out_specs=pl.BlockSpec((T, D), lambda i, j: (i, 0)),
            scratch_shapes=[pltpu.VMEM((T, D), acc_dtype)],
        ),
        compiler_params=pltpu.CompilerParams(
            dimension_semantics=("parallel", "arbitrary"),
            vmem_limit_bytes=vmem_limit,
        ),
    )(ids, frozen_p, trainable_p)
    return out[:n]


# ---------------------------------------------------------------------------
# Path 2: data-dependent row gather (vocab large relative to token block)
# ---------------------------------------------------------------------------
def _gather_kernel(pivot, T, ids_ref, frozen_row_ref, trainable_row_ref, o_ref):
    i = pl.program_id(0)
    t = pl.program_id(1)
    tok = ids_ref[i * T + t]
    row = jnp.where(tok < pivot,
                    frozen_row_ref[...].astype(o_ref.dtype),
                    trainable_row_ref[...].astype(o_ref.dtype))
    # Output block stays resident across the inner axis; written back once per
    # token block (lane-dense (T, D) store to HBM).
    o_ref[pl.ds(t, 1), :] = row


def _pf_embedding_gather(flat_ids, frozen_w, trainable_w, pivot, token_block):
    D = trainable_w.shape[1]
    n_frozen, n_trainable = frozen_w.shape[0], trainable_w.shape[0]
    n = flat_ids.shape[0]
    out_dtype = trainable_w.dtype

    T = min(token_block, _round_up(n, 8))
    n_pad = _round_up(n, T)
    ids = jnp.pad(flat_ids, (0, n_pad - n))  # pad id 0 (< pivot, valid)

    def frozen_map(i, t, ids_ref):
        tok = ids_ref[i * T + t]
        return (jnp.clip(tok, 0, n_frozen - 1), 0)

    def trainable_map(i, t, ids_ref):
        tok = ids_ref[i * T + t]
        return (jnp.clip(tok - pivot, 0, n_trainable - 1), 0)

    kernel = functools.partial(_gather_kernel, pivot, T)

    out = pl.pallas_call(
        kernel,
        out_shape=jax.ShapeDtypeStruct((n_pad, D), out_dtype),
        grid_spec=pltpu.PrefetchScalarGridSpec(
            num_scalar_prefetch=1,           # ids land in SMEM, drive index_maps
            grid=(n_pad // T, T),
            in_specs=[
                pl.BlockSpec((pl.Element(1), D), frozen_map),
                pl.BlockSpec((pl.Element(1), D), trainable_map),
            ],
            out_specs=pl.BlockSpec((T, D), lambda i, t, ids_ref: (i, 0)),
        ),
        compiler_params=pltpu.CompilerParams(
            dimension_semantics=("parallel", "arbitrary"),
        ),
    )(ids, frozen_w, trainable_w)
    return out[:n]


# ---------------------------------------------------------------------------
# Public wrapper with the algorithm switch
# ---------------------------------------------------------------------------
def pf_embedding(x, frozen_w, trainable_w, pivot, *,
                 token_block=256, row_block=256, gather_token_block=128,
                 mode="auto"):
    """Partially-frozen embedding lookup.

    x:           int array of token ids, any shape
    frozen_w:    (pivot, D) frozen embedding table
    trainable_w: (num_embeddings - pivot, D) trainable embedding table
    """
    assert frozen_w.shape[0] == pivot and pivot >= 1
    assert trainable_w.shape[0] >= 1
    assert frozen_w.shape[1] == trainable_w.shape[1]
    assert token_block % 8 == 0 and row_block % 8 == 0 and gather_token_block % 8 == 0
    D = trainable_w.shape[1]
    vocab = pivot + trainable_w.shape[0]

    flat = x.reshape(-1).astype(jnp.int32)

    if mode == "auto":
        # Streaming reads the whole (padded) table once per token block;
        # the row gather reads ~2 rows per token plus per-step overhead.
        mode = "gather" if vocab > 8 * token_block else "stream"

    if mode == "gather":
        out = _pf_embedding_gather(flat, frozen_w, trainable_w, pivot,
                                   gather_token_block)
    else:
        out = _pf_embedding_stream(flat, frozen_w, trainable_w, pivot,
                                   token_block, row_block)
    return out.reshape(*x.shape, D)


if __name__ == "__main__":
    # Small, deterministic setup consistent with the module's __init__:
    # an nn.Embedding(num_embeddings, embedding_dim) split at `pivot`.
    num_embeddings = 32
    embedding_dim = 128
    pivot = 24
    batch, seq = 2, 8

    key = jax.random.PRNGKey(0)
    k_w, k_x = jax.random.split(key)

    full_weight = jax.random.normal(
        k_w, (num_embeddings, embedding_dim), dtype=jnp.float32
    )
    frozen_w = full_weight[:pivot]
    trainable_w = full_weight[pivot:]

    x = jax.random.randint(k_x, (batch, seq), 0, num_embeddings, dtype=jnp.int32)

    # Reference: plain gather from the concatenated table (same semantics as
    # the PyTorch forward; padding_idx/scale_grad_by_freq only affect backward).
    ref = jnp.take(full_weight, x, axis=0)

    # Streaming (one-hot matmul) path — selected automatically for small vocab.
    out_stream = jax.block_until_ready(pf_embedding(x, frozen_w, trainable_w, pivot))
    assert out_stream.shape == (batch, seq, embedding_dim)
    assert out_stream.dtype == trainable_w.dtype
    assert jnp.allclose(out_stream, ref, rtol=1e-5, atol=1e-5), "stream path mismatch"

    # Row-gather path — what a large-vocab model would select.
    out_gather = jax.block_until_ready(
        pf_embedding(x, frozen_w, trainable_w, pivot, mode="gather"))
    assert out_gather.shape == (batch, seq, embedding_dim)
    assert out_gather.dtype == trainable_w.dtype
    assert jnp.allclose(out_gather, ref, rtol=1e-5, atol=1e-5), "gather path mismatch"

    print("KERNEL_OK")
</pallas_src>

<mosaic_0001>
module attributes {stable_mosaic.version = 11 : i64} {
  func.func @_stream_kernel(%arg0: i32, %arg1: i32, %arg2: memref<16x1xi32, #tpu.memory_space<vmem>>, %arg3: memref<24x128xf32, #tpu.memory_space<vmem>>, %arg4: memref<8x128xf32, #tpu.memory_space<vmem>>, %arg5: memref<16x128xf32, #tpu.memory_space<vmem>>, %arg6: memref<16x128xf32, #tpu.memory_space<vmem>>) attributes {dimension_semantics = [#tpu.dimension_semantics<parallel>, #tpu.dimension_semantics<arbitrary>], iteration_bounds = array<i64: 1, 2>, scalar_prefetch = 0 : i64, scratch_operands = 1 : i64, tpu.core_type = #tpu.core_type<tc>, window_params = [{transform_indices = @transform_0, window_bounds = array<i64: 16, 1>}, {transform_indices = @transform_1, window_bounds = array<i64: 24, 128>}, {transform_indices = @transform_2, window_bounds = array<i64: 8, 128>}, {transform_indices = @transform_3, window_bounds = array<i64: 16, 128>}]} {
    %c0_i32 = arith.constant 0 : i32
    %0 = arith.cmpi eq, %arg1, %c0_i32 : i32
    %1 = arith.extui %0 : i1 to i32
    %c0_i32_0 = arith.constant 0 : i32
    %2 = arith.cmpi ne, %1, %c0_i32_0 : i32
    scf.if %2 {
      %cst = arith.constant 0.000000e+00 : f32
      %13 = vector.broadcast %cst : f32 to vector<16x128xf32>
      %c0_7 = arith.constant 0 : index
      %c0_8 = arith.constant 0 : index
      %14 = vector.load %arg6[%c0_7, %c0_8] : memref<16x128xf32, #tpu.memory_space<vmem>>, vector<16x128xf32>
      tpu.vector_store %arg6[%c0_7, %c0_8], %13 {strides = array<i32>} : memref<16x128xf32, #tpu.memory_space<vmem>>, vector<16x128xf32>,
    } else {
    }
    %c0 = arith.constant 0 : index
    %c0_1 = arith.constant 0 : index
    %3 = vector.load %arg2[%c0, %c0_1] : memref<16x1xi32, #tpu.memory_space<vmem>>, vector<16x1xi32>
    %c1_i32 = arith.constant 1 : i32
    %4 = arith.cmpi slt, %arg1, %c1_i32 : i32
    %5 = arith.extui %4 : i1 to i32
    %c0_i32_2 = arith.constant 0 : i32
    %6 = arith.cmpi ne, %5, %c0_i32_2 : i32
    scf.if %6 {
      %c24_i32 = arith.constant 24 : i32
      %13 = arith.muli %arg1, %c24_i32 : i32
      %14 = tpu.iota {dimensions = array<i32: 1>} : vector<1x24xi32>
      %15 = vector.broadcast %13 : i32 to vector<1x24xi32>
      %16 = arith.addi %15, %14 : vector<1x24xi32>
      %17 = vector.broadcast %3 : vector<16x1xi32> to vector<16x24xi32>
      %18 = vector.broadcast %16 : vector<1x24xi32> to vector<16x24xi32>
      %19 = arith.cmpi eq, %17, %18 : vector<16x24xi32>
      %20 = arith.extui %19 : vector<16x24xi1> to vector<16x24xi32>
      %21 = arith.sitofp %20 : vector<16x24xi32> to vector<16x24xf32>
      %c0_7 = arith.constant 0 : index
      %c0_8 = arith.constant 0 : index
      %22 = vector.load %arg6[%c0_7, %c0_8] : memref<16x128xf32, #tpu.memory_space<vmem>>, vector<16x128xf32>
      %c0_9 = arith.constant 0 : index
      %c0_10 = arith.constant 0 : index
      %23 = vector.load %arg3[%c0_9, %c0_10] : memref<24x128xf32, #tpu.memory_space<vmem>>, vector<24x128xf32>
      %cst = arith.constant dense<0.000000e+00> : vector<16x128xf32>
      %24 = tpu.matmul %21, %23, %cst {dimension_numbers = #tpu.dot_dimension_numbers<[1], [0], [0], [1], [0, 0, 1, 1], [], []>} : vector<16x24xf32>, vector<24x128xf32>, vector<16x128xf32> -> vector<16x128xf32>
      %25 = arith.addf %22, %24 : vector<16x128xf32>
      %c0_11 = arith.constant 0 : index
      %c0_12 = arith.constant 0 : index
      %26 = vector.load %arg6[%c0_11, %c0_12] : memref<16x128xf32, #tpu.memory_space<vmem>>, vector<16x128xf32>
      tpu.vector_store %arg6[%c0_11, %c0_12], %25 {strides = array<i32>} : memref<16x128xf32, #tpu.memory_space<vmem>>, vector<16x128xf32>,
    } else {
    }
    %c1_i32_3 = arith.constant 1 : i32
    %7 = arith.cmpi sge, %arg1, %c1_i32_3 : i32
    %8 = arith.extui %7 : i1 to i32
    %c0_i32_4 = arith.constant 0 : i32
    %9 = arith.cmpi ne, %8, %c0_i32_4 : i32
    scf.if %9 {
      %c1_i32_7 = arith.constant 1 : i32
      %13 = arith.subi %arg1, %c1_i32_7 : i32
      %c8_i32 = arith.constant 8 : i32
      %14 = arith.muli %13, %c8_i32 : i32
      %c24_i32 = arith.constant 24 : i32
      %15 = arith.addi %c24_i32, %14 : i32
      %16 = tpu.iota {dimensions = array<i32: 1>} : vector<1x8xi32>
      %17 = vector.broadcast %15 : i32 to vector<1x8xi32>
      %18 = arith.addi %17, %16 : vector<1x8xi32>
      %19 = vector.broadcast %3 : vector<16x1xi32> to vector<16x8xi32>
      %20 = vector.broadcast %18 : vector<1x8xi32> to vector<16x8xi32>
      %21 = arith.cmpi eq, %19, %20 : vector<16x8xi32>
      %22 = arith.extui %21 : vector<16x8xi1> to vector<16x8xi32>
      %23 = arith.sitofp %22 : vector<16x8xi32> to vector<16x8xf32>
      %c0_8 = arith.constant 0 : index
      %c0_9 = arith.constant 0 : index
      %24 = vector.load %arg6[%c0_8, %c0_9] : memref<16x128xf32, #tpu.memory_space<vmem>>, vector<16x128xf32>
      %c0_10 = arith.constant 0 : index
      %c0_11 = arith.constant 0 : index
      %25 = vector.load %arg4[%c0_10, %c0_11] : memref<8x128xf32, #tpu.memory_space<vmem>>, vector<8x128xf32>
      %cst = arith.constant dense<0.000000e+00> : vector<16x128xf32>
      %26 = tpu.matmul %23, %25, %cst {dimension_numbers = #tpu.dot_dimension_numbers<[1], [0], [0], [1], [0, 0, 1, 1], [], []>} : vector<16x8xf32>, vector<8x128xf32>, vector<16x128xf32> -> vector<16x128xf32>
      %27 = arith.addf %24, %26 : vector<16x128xf32>
      %c0_12 = arith.constant 0 : index
      %c0_13 = arith.constant 0 : index
      %28 = vector.load %arg6[%c0_12, %c0_13] : memref<16x128xf32, #tpu.memory_space<vmem>>, vector<16x128xf32>
      tpu.vector_store %arg6[%c0_12, %c0_13], %27 {strides = array<i32>} : memref<16x128xf32, #tpu.memory_space<vmem>>, vector<16x128xf32>,
    } else {
    }
    %c1_i32_5 = arith.constant 1 : i32
    %10 = arith.cmpi eq, %arg1, %c1_i32_5 : i32
    %11 = arith.extui %10 : i1 to i32
    %c0_i32_6 = arith.constant 0 : i32
    %12 = arith.cmpi ne, %11, %c0_i32_6 : i32
    scf.if %12 {
      %c0_7 = arith.constant 0 : index
      %c0_8 = arith.constant 0 : index
      %13 = vector.load %arg6[%c0_7, %c0_8] : memref<16x128xf32, #tpu.memory_space<vmem>>, vector<16x128xf32>
      %c0_9 = arith.constant 0 : index
      %c0_10 = arith.constant 0 : index
      %14 = vector.load %arg5[%c0_9, %c0_10] : memref<16x128xf32, #tpu.memory_space<vmem>>, vector<16x128xf32>
      tpu.vector_store %arg5[%c0_9, %c0_10], %13 {strides = array<i32>} : memref<16x128xf32, #tpu.memory_space<vmem>>, vector<16x128xf32>,
    } else {
    }
    return
  }
  func.func @transform_0(%arg0: i32, %arg1: i32) -> (i32, i32) {
    %c0_i32 = arith.constant 0 : i32
    %c0_i32_0 = arith.constant 0 : i32
    return %arg0, %c0_i32 : i32, i32
  }
  func.func @transform_1(%arg0: i32, %arg1: i32) -> (i32, i32) {
    %c0_i32 = arith.constant 0 : i32
    %0 = arith.minsi %arg1, %c0_i32 : i32
    %c0_i32_0 = arith.constant 0 : i32
    %c0_i32_1 = arith.constant 0 : i32
    return %0, %c0_i32_0 : i32, i32
  }
  func.func @transform_2(%arg0: i32, %arg1: i32) -> (i32, i32) {
    %c1_i32 = arith.constant 1 : i32
    %0 = arith.subi %arg1, %c1_i32 : i32
    %c0_i32 = arith.constant 0 : i32
    %1 = arith.maxsi %0, %c0_i32 : i32
    %c0_i32_0 = arith.constant 0 : i32
    %c0_i32_1 = arith.constant 0 : i32
    return %1, %c0_i32_0 : i32, i32
  }
  func.func @transform_3(%arg0: i32, %arg1: i32) -> (i32, i32) {
    %c0_i32 = arith.constant 0 : i32
    %c0_i32_0 = arith.constant 0 : i32
    return %arg0, %c0_i32 : i32, i32
  }
}

</mosaic_0001>

<bundles_post_ra>
// kernel: tpu_custom_call.1
= control target key start
LH: loop header
LB: loop body
LE: loop exit
PB: predicated region body
PF: predicated region fallthrough
CT: control target
= control target key end

     0   :  { %8 = vsyncpa [#allocation4], 0  ;;  %s1000_s0 = inlined_call_operand.vmem [shape: s32[16,1], index: 0, kind: input, shape index: {}]   ;;  %s1001_s1 = inlined_call_operand.hbm [shape: f32[24,128], index: 1, kind: input, shape index: {}]   ;;  %s1002_s2 = inlined_call_operand.vmem [shape: f32[8,128], index: 2, kind: input, shape index: {}]   ;;  %s1003_s3 = inlined_call_operand.hbm [shape: f32[16,128], index: 3, kind: output, shape index: {}]  }
   0x1   :  { %10 = vsyncpa [#allocation4 + $0x1], 0 }
   0x2   :  { %11 = vsyncpa [#allocation5], 0  ;;  %s879_s12 = smov 0   ;;  %s881_s13 = smov 0  }
   0x3   :  { %s883_s14 = smov 0   ;;  %s885_s15 = smov 0  }
   0x4   :  { %s887_s16 = smov 0  }
   0x5 LB: > { %s604_s17 = sadd.s32 4294967295, %s846_s16   ;;  %s26_s18 = sadd.s32 1, %s842_s15  ;;  %s846_s16 = sphi %s887_s16, %s17_s16   ;;  %s842_s15 = sphi %s885_s15, %s1013_s15   ;;  %s838_s14 = sphi %s883_s14, %s1012_s14   ;;  %s834_s13 = sphi %s881_s13, %s990_s13   ;;  %s830_s12 = sphi %s879_s12, %s1011_s12  }
   0x6   : > { %p27_p0 = scmp.ge.s32.totalorder %s26_s18, 2  ;;  %p827_p1 = scmp.ne.s32.totalorder %s834_s13, 0 }
   0x7   : > { %p74_p2 = scmp.eq.s32.totalorder %s846_s16, 0  ;;  %p79_p3 = scmp.ne.s32.totalorder %s834_s13, %s830_s12 }
   0x8   : > { %s1015_s18 = smov (%p27_p0, %s26_s18), 0  ;;  %p80_p4 = scmp.eq.s32.totalorder %s604_s17, 0 }
   0x9   : > { %p75_p5 = por %p827_p1, %p74_p2  ;;  %p676_p7 = scmp.lt.s32.totalorder %s846_s16, 2 }
   0xa   : > { %p911_p6 = por %p80_p4, %p79_p3  ;;  %s848_s21 = smov [#allocation3]  }
   0xb   : > { %p916_p8 = pnand %p676_p7, %p75_p5  ;;  %s183_s22 = sshll.u32 %s848_s21, 4  ;;  %s184_s22 = int_to_ptr.vmem [resolvable:$true] %s183_s22 }
   0xc   : > { %s1006_s19 = scalar_select %p911_p6, 1, 0 }
   0xd   : > { %s1007_s20 = scalar_select %p916_p8, 1, 0 }
   0xe   : > { %s739_s25 = scalar_lea.hbm %s1001_s1, 384  ;;  %p741_p10 = pneg %p916_p8 }
   0xf   : > { %p740_p9 = scmp.ne.s32.totalorder %s1001_s1, %s739_s25  ;;  %p746_p13 = scmp.lt.u32.totalorder %s739_s25, %s739_s25 }
  0x10   : > { %p748_p0 = scmp.lt.u32.totalorder %s739_s25, %s1001_s1 }
  0x11   : > { %p742_p11 = pnand %p741_p10, %p740_p9 }
  0x12   : > { %p749_p1 = por %p748_p0, %p746_p13 }
  0x13   : > { %p743_p12 = pneg %p742_p11 }
  0x15   : > { %p750_p2 = pnand %p749_p1, %p743_p12 }
  0x17   : > { %753 = shalt.err (!%p750_p2)
}
  0x18   : > { %s754_s30 = scalar_lea.vmem %s184_s22, 384  ;;  %s761_s4 = scalar_lea.vmem %s184_s22, 768 }
  0x19   : > { %p755_p3 = scmp.ne.s32.totalorder %s184_s22, %s754_s30  ;;  %p762_p7 = scmp.lt.s32.totalorder %s184_s22, %s184_s22 }
  0x1a   : > { %p763_p6 = scmp.lt.s32.totalorder %s761_s4, %s754_s30 }
  0x1b   : > { %p757_p4 = pnand %p755_p3, %p741_p10 }
  0x1c   : > { %p764_p8 = por %p763_p6, %p762_p7 }
  0x1d   : > { %p758_p5 = pneg %p757_p4 }
  0x1f   : > { %p765_p9 = pnand %p764_p8, %p758_p5 }
  0x21   : > { %768 = shalt.err (!%p765_p9)
}
  0x22   : > { %s849_s5 = smov 128   ;;  %s850_s6 = smov 8  }
  0x23   : > { %p1008_p11 = scmp.ne.s32.totalorder %s1007_s20, 0  ;;  %p611_p12 = scmp.ge.s32.totalorder %s846_s16, 1 }
  0x24   : > { %p204_p13 = scmp.lt.s32.totalorder %s846_s16, 3 }
  0x25   : > { %675 = dma.hbm_to_vmem [thread:$0]  (!%p1008_p11), %s1001_s1, 384, %s184_s22, [#allocation4], %s849_s5, %s849_s5, %s850_s6  }
  0x26   : > { %p205_p10 = pnand %p611_p12, %p204_p13 }
  0x27   : > { %s210_s9 = sand.u32 (!%p205_p10), 1, %s834_s13   ;;  %p1009_p6 = scmp.ne.s32.totalorder (!%p205_p10), %s1006_s19, 0 }
  0x28   : > { %208 = sbr.rel (%p205_p10) target bundleno = 798 (0x31e), region = 32  ;;  %s211_s11 = scalar_lea.sflag (!%p205_p10), [#allocation4], %s210_s9 }
  0x29   : > { %s665_s10 = smul.u32 (!%p205_p10), 24, %s210_s9 }
  0x2b   : > { %s214_s12 = scalar_lea.vmem (!%p205_p10), [#allocation3], %s665_s10 }
  0x2f   : > { %820 = dma.done.wait (%p1009_p6), %s211_s11, 384  }
  0x30   : > { %822 = vsyncadd (%p1009_p6), %s211_s11, 4294966912  ;;  %p619_p8 = scmp.ne.s32.totalorder %s838_s14, 0 }
  0x31   : > { %v851_v0 = vmov (!%p619_p8), 0.0  }
  0x32   : > { %267 = sbr.rel (%p619_p8) target bundleno = 57 (0x39), region = 40  ;;  %268 = vst [vmem:[#allocation2] sm:$0xff] (!%p619_p8), %v851_v0  ;;  %269 = vst [vmem:[#allocation2 + $0x8] sm:$0xff] (!%p619_p8), %v851_v0 }
  0x39 PF: > { %v270_v1 = vld [vmem:[%s1000_s0] sm:$0xff]  ;;  %v271_v2 = vld [vmem:[%s1000_s0 + $0x8] sm:$0xff]  ;;  %p620_p0 = scmp.ge.s32.totalorder %s838_s14, 1 }
  0x3a   : > { %v295_v3 = vld [vmem:[%s214_s12] sm:$0xff] (!%p620_p0)  ;;  %v296_v4 = vld [vmem:[%s214_s12 + $0x8] sm:$0xff] (!%p620_p0)  ;;  %v852_v5 = vmov (!%p620_p0), 0   ;;  %v297_v7 = vld [vmem:[%s214_s12 + $0x10] sm:$0xff] (!%p620_p0)  ;;  %v277_v8 = vlaneseq (!%p620_p0)  ;;  %s276_s19 = smul.u32 (!%p620_p0), 24, %s838_s14  ;;  %vm298_vm0 = vcmask (!%p620_p0), 195584  }
  0x3b   : > { %275 = sbr.rel (%p620_p0) target bundleno = 410 (0x19a), region = 44  ;;  %737 = vset.pattern.permute.xlu0 (!%p620_p0), %v852_v5  ;;  %v660_v6 = vpack.c.bf16 (!%p620_p0), %v296_v4, %v295_v3  ;;  %v853_v13 = vmov (!%p620_p0), 0.0   ;;  %v294_v17 = vld [vmem:[#allocation2 + $0x8] sm:$0xff] (!%p620_p0)  ;;  %v293_v18 = vld [vmem:[#allocation2] sm:$0xff] (!%p620_p0) }
  0x3c   : > { %282 = vperm.xlu0 (!%p620_p0), %737, %v270_v1   ;;  %v278_v9 = vand.u32 (!%p620_p0), 127, %v277_v8  ;;  %v279_v10 = vstv (!%p620_p0), %s276_s19 }
  0x3d   : > { %661 = vmatprep.subr.bf16.mxu0 (!%p620_p0), %v660_v6 }
  0x3e   : > { %663 = vmatpush3.bf16.msra.mxu0 (!%p620_p0), %v660_v6  ;;  %v280_v11 = vadd.s32 (!%p620_p0), %v279_v10, %v278_v9 }
  0x3f   : > { %650 = vmatprep.subr.mxu0 (!%p620_p0), %v297_v7 }
  0x40   : > { %285 = vperm.xlu0 (!%p620_p0), %737, %v271_v2  }
  0x42   : > { %651 = vmatpush3.msra.mxu0 %v297_v7 }
  0xbb   : > { %v283_v12 = vpop.permute.xlu0 %282 }
  0xbc   : > { %vm287_vm1 = vcmp.eq.s32.totalorder %v283_v12, %v280_v11 }
  0xbd   : > { %v621_v14 = vsel %vm287_vm1, 1.0, %v853_v13 }
  0xbe   : > { %652 = vmatprep.mubr.msk.f32.mxu0 %vm298_vm0, %v621_v14 }
  0xbf   : > { %v286_v15 = vpop.permute.xlu0 %285 }
  0xc0   : > { %vm288_vm2 = vcmp.eq.s32.totalorder %v286_v15, %v280_v11 }
  0xc1   : > { %v622_v16 = vsel %vm288_vm2, 1.0, %v853_v13 }
  0xc2   : > { %653 = vmatmul.mubr.msk.f32.vlgmr.msra.gmra.mrb[0].mxu0 %vm298_vm0, %v622_v16 }
 0x195   : > { %v654_v19 = vpop.f32.mrb[0].mxu0 }
 0x196   : > { %v381_v20 = vadd.f32 %v654_v19, %v294_v17  ;;  %v371_v21 = vpop.f32.mrb[1].mxu0 }
 0x197   : > { %v380_v22 = vadd.f32 %v371_v21, %v293_v18 }
 0x198   : > { %383 = vst [vmem:[#allocation2 + $0x8] sm:$0xff] %v381_v20 }
 0x199   : > { %382 = vst [vmem:[#allocation2] sm:$0xff] %v380_v22 }
 0x19a PF: > { %p625_p1 = scmp.lt.s32.totalorder %s838_s14, 1 }
 0x19b   : > { %v854_v23 = vmov (!%p625_p1), 0   ;;  %v409_v24 = vld [vmem:[%s1002_s2] sm:$0xff] (!%p625_p1)  ;;  %s626_s26 = sadd.s32 (!%p625_p1), 4294967295, %s838_s14  ;;  %v391_v25 = vlaneseq (!%p625_p1)  ;;  %vm410_vm3 = vcmask (!%p625_p1), 64512   ;;  %v855_v30 = vmov (!%p625_p1), 0.0  }
 0x19c   : > { %387 = sbr.rel (%p625_p1) target bundleno = 763 (0x2fb), region = 48  ;;  %738 = vset.pattern.permute.xlu0 (!%p625_p1), %v854_v23  ;;  %655 = vmatprep.subr.mxu0 (!%p625_p1), %v409_v24  ;;  %s627_s27 = sshll.u32 (!%p625_p1), %s626_s26, 3 }
 0x19d   : > { %396 = vperm.xlu0 (!%p625_p1), %738, %v270_v1   ;;  %656 = vmatpush3.msra.mxu0 (!%p625_p1), %v409_v24  ;;  %s390_s28 = sadd.s32 (!%p625_p1), 24, %s627_s27  ;;  %v392_v26 = vand.u32 (!%p625_p1), 127, %v391_v25 }
 0x19e   : > { %v393_v27 = vstv (!%p625_p1), %s390_s28 }
 0x19f   : > { %v394_v28 = vadd.s32 (!%p625_p1), %v393_v27, %v392_v26  ;;  %v408_v34 = vld [vmem:[#allocation2 + $0x8] sm:$0xff] (!%p625_p1) }
 0x1a0   : > { %v407_v35 = vld [vmem:[#allocation2] sm:$0xff] (!%p625_p1) }
 0x1a1   : > { %399 = vperm.xlu0 (!%p625_p1), %738, %v271_v2  }
 0x21c   : > { %v397_v29 = vpop.permute.xlu0 %396 }
 0x21d   : > { %vm401_vm4 = vcmp.eq.s32.totalorder %v397_v29, %v394_v28 }
 0x21e   : > { %v628_v31 = vsel %vm401_vm4, 1.0, %v855_v30 }
 0x21f   : > { %657 = vmatprep.mubr.msk.f32.mxu0 %vm410_vm3, %v628_v31 }
 0x220   : > { %v400_v32 = vpop.permute.xlu0 %399 }
 0x221   : > { %vm402_vm5 = vcmp.eq.s32.totalorder %v400_v32, %v394_v28 }
 0x222   : > { %v629_v33 = vsel %vm402_vm5, 1.0, %v855_v30 }
 0x223   : > { %658 = vmatmul.mubr.msk.f32.vlgmr.msra.gmra.mrb[0].mxu0 %vm410_vm3, %v629_v33 }
 0x2f6   : > { %v659_v36 = vpop.f32.mrb[0].mxu0 }
 0x2f7   : > { %v493_v37 = vadd.f32 %v659_v36, %v408_v34  ;;  %v483_v38 = vpop.f32.mrb[1].mxu0 }
 0x2f8   : > { %v492_v39 = vadd.f32 %v483_v38, %v407_v35 }
 0x2f9   : > { %495 = vst [vmem:[#allocation2 + $0x8] sm:$0xff] %v493_v37 }
 0x2fa   : > { %494 = vst [vmem:[#allocation2] sm:$0xff] %v492_v39 }
 0x2fb PF: > { %p632_p2 = scmp.ne.s32.totalorder %s838_s14, 1 }
 0x2fd   : > { %499 = sbr.rel (%p632_p2) target bundleno = 772 (0x304), region = 52 }
 0x300   : > { %v501_v41 = vld [vmem:[#allocation2 + $0x8] sm:$0xff] (!%p632_p2) }
 0x301   : > { %v500_v40 = vld [vmem:[#allocation2] sm:$0xff] (!%p632_p2)  ;;  %503 = vst [vmem:[#allocation6 + $0x8] sm:$0xff] (!%p632_p2), %v501_v41 }
 0x302   : > { %502 = vst [vmem:[#allocation6] sm:$0xff] (!%p632_p2), %v500_v40 }
 0x304 PF: > { %p960_p3 = scmp.eq.s32.totalorder %s604_s17, 1  ;;  %s856_s30 = smov [#allocation6]  }
 0x305   : > { %s513_s4 = sshll.u32 %s856_s30, 4  ;;  %s514_s4 = int_to_ptr.vmem [resolvable:$true] %s513_s4 }
 0x306   : > { %s769_s5 = scalar_lea.vmem %s514_s4, 256  ;;  %p776_p9 = scmp.lt.s32.totalorder %s514_s4, %s514_s4 }
 0x307   : > { %p770_p4 = scmp.ne.s32.totalorder %s514_s4, %s769_s5  ;;  %p777_p11 = scmp.lt.s32.totalorder %s769_s5, %s769_s5 }
 0x309   : > { %p771_p5 = pnand %p770_p4, %p960_p3  ;;  %p778_p12 = por %p777_p11, %p776_p9 }
 0x30b   : > { %p772_p7 = pneg %p771_p5 }
 0x30d   : > { %p779_p13 = pnand %p778_p12, %p772_p7 }
 0x30f   : > { %782 = shalt.err (!%p779_p13)
}
 0x310   : > { %s783_s17 = scalar_lea.hbm %s1003_s3, 256 }
 0x311   : > { %p784_p10 = scmp.ne.s32.totalorder %s1003_s3, %s783_s17  ;;  %p789_p0 = scmp.lt.u32.totalorder %s783_s17, %s1003_s3 }
 0x313   : > { %p785_p6 = pnand %p784_p10, %p960_p3 }
 0x315   : > { %p786_p8 = pneg %p785_p6 }
 0x317   : > { %p791_p1 = pnand %p789_p0, %p786_p8 }
 0x319   : > { %794 = shalt.err (!%p791_p1)
}
 0x31a   : > { %s857_s11 = smov 128   ;;  %s858_s12 = smov 8  }
 0x31b   : > { %669 = dma.vmem_to_hbm [thread:$0]  (%p960_p3), %s514_s4, 256, %s1003_s3, [#allocation5], %s857_s11, %s857_s11, %s858_s12  }
 0x31c   : > { %824 = dma.done.wait (%p960_p3), [#allocation5], 256  }
 0x31d   : > { %826 = vsyncadd (%p960_p3), [#allocation5], 4294967040 }
 0x31e PF: > { %s17_s16 = sadd.s32 1, %s846_s16   ;;  %s1011_s12 = smov %s834_s13 }
 0x31f   : > { %p14_p2 = scmp.ge.s32.totalorder %s17_s16, 4   ;;  %s990_s13 = smov 0  }
 0x320   : > { %s1012_s14 = smov %s842_s15  ;;  %s1013_s15 = smov %s1015_s18 }
 0x321   :  { %16 = sbr.rel (!%p14_p2) target bundleno = 5 (0x5), region = 92 }
 0x328   :  { %529 = vsyncpa [#allocation4], 1 }
 0x329   :  { %531 = vsyncpa [#allocation4 + $0x1], 1 }
 0x32a   :  { %532 = vsyncpa [#allocation5], 1 }
 0x32b   :  { %534 = vsyncpa [#allocation5 + $0x1], 1 }

</bundles_post_ra>
